<compile_context>
chip_gen: v5e
topology: v5e:2x2
jax: 0.10.0
libtpu: 0.0.40
codegen_flags: <defaults>
</compile_context>

<pallas_src>
import functools

import jax
import jax.numpy as jnp
from jax.experimental import pallas as pl
from jax.experimental.pallas import tpu as pltpu

COLS = 512            # lane-dense last dim (multiple of 128)
MAX_BLOCK_ROWS = 512  # 512x512 f32 = 1 MiB / block; ~4 MiB double-buffered (OK on v5e/v6e/v7x)


def _absmax_kernel(x_ref, out_ref, *, valid_rows):
    """Range tracker: per-block partial abs-max.

    For the symmetric signed quantizer float_range = max(|min(x)|, |max(x)|)
    == max(|x|), so tracking the abs-max alone is exact.
    """
    i = pl.program_id(0)
    xf = x_ref[...].astype(jnp.float32)
    # The last grid step may map to a block extending past the array; Pallas
    # pads that region with unspecified data, so mask those rows to 0 (which
    # never affects an abs-max).
    row = jax.lax.broadcasted_iota(jnp.int32, xf.shape, 0)
    rows_left = valid_rows - i * xf.shape[0]
    ax = jnp.where(row < rows_left, jnp.abs(xf), jnp.float32(0.0))
    out_ref[0] = jnp.max(ax, keepdims=True)           # (1, 1) slab of the (1,1,1) block


def _quant_kernel(params_ref, x_ref, o_ref, *, qmin, qmax):
    """quantize -> round (floor(x+0.5)) -> clamp -> dequantize, elementwise."""
    scale = params_ref[0]       # quantized_range / float_range   (SMEM scalar)
    inv_scale = params_ref[1]   # float_range / quantized_range   (avoids vector divide)
    x = x_ref[...].astype(jnp.float32)
    q = x * scale                                       # quantize (zero_point == 0, dropped)
    r = jnp.floor(q + 0.5)                              # Round.forward
    c = jnp.clip(r, jnp.float32(qmin), jnp.float32(qmax))  # clamp to [min_val, max_val]
    o_ref[...] = (c * inv_scale).astype(o_ref.dtype)    # dequantize


def quantizer_forward(x, bits_precision=8):
    qmin = -(1 << (bits_precision - 1))
    qmax = (1 << (bits_precision - 1)) - 1
    quantized_range = float(min(abs(qmin), abs(qmax)))

    orig_shape = x.shape
    orig_dtype = x.dtype
    total = x.size

    # Flatten row-major into a lane-dense 2-D slab (rows, COLS).
    granule = 8 * COLS
    padded = pl.cdiv(total, granule) * granule
    x_flat = x.reshape(-1)
    if padded != total:
        # Zero padding: harmless for abs-max, and the padded outputs are
        # sliced off below.  When total is already a multiple of 8*COLS this
        # copy is skipped entirely.
        x_flat = jnp.pad(x_flat, (0, padded - total))
    rows = padded // COLS                               # multiple of 8
    x2 = x_flat.reshape(rows, COLS)                     # original dtype, no f32 inflation

    block_rows = min(MAX_BLOCK_ROWS, rows)
    nblocks = pl.cdiv(rows, block_rows)

    # ---- Pass 1: range tracker (parallel per-block partial abs-max). ----
    partials = pl.pallas_call(
        functools.partial(_absmax_kernel, valid_rows=rows),
        out_shape=jax.ShapeDtypeStruct((nblocks, 1, 1), jnp.float32),
        grid=(nblocks,),
        in_specs=[pl.BlockSpec((block_rows, COLS), lambda i: (i, 0))],
        out_specs=pl.BlockSpec((1, 1, 1), lambda i: (i, 0, 0)),
        compiler_params=pltpu.CompilerParams(dimension_semantics=("parallel",)),
    )(x2)

    # ---- update_params (SymmetricQuantizer / SignedQuantizer): scalar math. ----
    # Note: all-zero input gives float_range == 0 -> inf/NaN, matching the
    # reference PyTorch module's behavior (no eps clamp to keep semantics).
    float_range = jnp.max(partials)
    scale = jnp.float32(quantized_range) / float_range
    inv_scale = float_range / jnp.float32(quantized_range)
    params = jnp.stack([scale, inv_scale]).astype(jnp.float32)   # -> SMEM in pass 2

    # ---- Pass 2: quantize -> round -> clamp -> dequantize. ----
    y2 = pl.pallas_call(
        functools.partial(_quant_kernel, qmin=qmin, qmax=qmax),
        out_shape=jax.ShapeDtypeStruct((rows, COLS), orig_dtype),
        grid=(nblocks,),
        in_specs=[pl.BlockSpec(memory_space=pltpu.MemorySpace.SMEM),
                  pl.BlockSpec((block_rows, COLS), lambda i: (i, 0))],
        out_specs=pl.BlockSpec((block_rows, COLS), lambda i: (i, 0)),
        compiler_params=pltpu.CompilerParams(dimension_semantics=("parallel",)),
    )(params, x2)

    y_flat = y2.reshape(-1)
    if padded != total:
        y_flat = y_flat[:total]
    return y_flat.reshape(orig_shape)


def _reference(x, bits_precision=8):
    """Faithful JAX port of the PyTorch forward (symmetric signed per-tensor)."""
    qmin = -(1 << (bits_precision - 1))
    qmax = (1 << (bits_precision - 1)) - 1
    xf = x.astype(jnp.float32)
    tmin, tmax = jnp.min(xf), jnp.max(xf)
    scale = jnp.float32(min(abs(qmin), abs(qmax))) / jnp.maximum(
        jnp.abs(tmin), jnp.abs(tmax))
    zp = jnp.float32(0.0)
    q = xf * scale - zp
    r = jnp.floor(q + 0.5)
    c = jnp.clip(r, qmin, qmax)
    return ((c + zp) / scale).astype(x.dtype)


if __name__ == "__main__":
    key = jax.random.PRNGKey(0)
    # NCHW input, matching a typical activation tensor fed to the Quantizer.
    x = jax.random.normal(key, (2, 4, 16, 16), dtype=jnp.float32) * 3.0

    out = quantizer_forward(x, bits_precision=8)
    out = jax.block_until_ready(out)

    ref = _reference(x, bits_precision=8)
    assert out.shape == x.shape and out.dtype == x.dtype
    assert jnp.allclose(out, ref, atol=1e-5, rtol=1e-5), "mismatch vs reference"

    print("KERNEL_OK")
</pallas_src>

<mosaic_0001>
module attributes {stable_mosaic.version = 11 : i64} {
  func.func @_absmax_kernel(%arg0: i32, %arg1: memref<8x512xf32, #tpu.memory_space<vmem>>, %arg2: memref<1x1x1xf32, #tpu.memory_space<vmem>>) attributes {dimension_semantics = [#tpu.dimension_semantics<parallel>], iteration_bounds = array<i64: 1>, scalar_prefetch = 0 : i64, scratch_operands = 0 : i64, tpu.core_type = #tpu.core_type<tc>, window_params = [{transform_indices = @transform_0, window_bounds = array<i64: 8, 512>}, {transform_indices = @transform_1, window_bounds = array<i64: 1, 1, 1>}]} {
    %c0 = arith.constant 0 : index
    %c0_0 = arith.constant 0 : index
    %0 = vector.load %arg1[%c0, %c0_0] : memref<8x512xf32, #tpu.memory_space<vmem>>, vector<8x512xf32>
    %1 = tpu.iota {dimensions = array<i32: 0>} : vector<8x512xi32>
    %c8_i32 = arith.constant 8 : i32
    %2 = arith.muli %arg0, %c8_i32 : i32
    %c8_i32_1 = arith.constant 8 : i32
    %3 = arith.subi %c8_i32_1, %2 : i32
    %4 = vector.broadcast %3 : i32 to vector<8x512xi32>
    %5 = arith.cmpi slt, %1, %4 : vector<8x512xi32>
    %6 = math.absf %0 : vector<8x512xf32>
    %cst = arith.constant 0.000000e+00 : f32
    %7 = vector.broadcast %cst : f32 to vector<8x512xf32>
    %8 = arith.select %5, %6, %7 : vector<8x512xi1>, vector<8x512xf32>
    %9 = vector.shape_cast %8 : vector<8x512xf32> to vector<1x8x512xf32>
    %cst_2 = arith.constant dense<0xFF800000> : vector<1xf32>
    %10 = vector.multi_reduction <maximumf>, %9, %cst_2 [1, 2] : vector<1x8x512xf32> to vector<1xf32>
    %11 = vector.shape_cast %10 : vector<1xf32> to vector<1x1x1xf32>
    %12 = vector.extract %11[0, 0, 0] : f32 from vector<1x1x1xf32>
    %13 = vector.broadcast %12 : f32 to vector<1x1xf32>
    %c0_3 = arith.constant 0 : index
    %c0_4 = arith.constant 0 : index
    %c0_5 = arith.constant 0 : index
    %14 = vector.load %arg2[%c0_3, %c0_4, %c0_5] : memref<1x1x1xf32, #tpu.memory_space<vmem>>, vector<1x1x1xf32>
    %15 = vector.shape_cast %14 : vector<1x1x1xf32> to vector<1x1xf32>
    %16 = vector.shape_cast %13 : vector<1x1xf32> to vector<1x1x1xf32>
    tpu.vector_store %arg2[%c0_3, %c0_4, %c0_5], %16 {strides = array<i32>} : memref<1x1x1xf32, #tpu.memory_space<vmem>>, vector<1x1x1xf32>,
    return
  }
  func.func @transform_0(%arg0: i32) -> (i32, i32) {
    %c0_i32 = arith.constant 0 : i32
    %c0_i32_0 = arith.constant 0 : i32
    return %arg0, %c0_i32 : i32, i32
  }
  func.func @transform_1(%arg0: i32) -> (i32, i32, i32) {
    %c0_i32 = arith.constant 0 : i32
    %c0_i32_0 = arith.constant 0 : i32
    %c0_i32_1 = arith.constant 0 : i32
    return %arg0, %c0_i32, %c0_i32_0 : i32, i32, i32
  }
}

</mosaic_0001>

<bundles_post_ra>
// kernel: tpu_custom_call.1
= control target key start
LH: loop header
LB: loop body
LE: loop exit
PB: predicated region body
PF: predicated region fallthrough
CT: control target
= control target key end

     0   :  { %6 = vsyncpa [#allocation3], 0  ;;  %s147_s0 = inlined_call_operand.hbm [shape: f32[8,512], index: 0, kind: input, shape index: {}]   ;;  %s148_s1 = inlined_call_operand.hbm [shape: f32[1,1,1], index: 1, kind: output, shape index: {}]  }
   0x1   :  { %7 = vsyncpa [#allocation4], 0  ;;  %s13_s8 = sshll.u32 %s147_s0, 4  ;;  %s129_s9 = smov [#allocation2]   ;;  %s14_s8 = int_to_ptr.hbm [resolvable:$true] %s13_s8 }
   0x2   :  { %s15_s10 = sshll.u32 %s129_s9, 4  ;;  %s16_s10 = int_to_ptr.vmem [resolvable:$true] %s15_s10 }
   0x3   :  { %18 = dma.hbm_to_vmem [thread:$0]  %s14_s8, 512, %s16_s10, [#allocation3]  }
   0x4   :  { %125 = dma.done.wait [#allocation3], 512  }
   0x5   :  { %126 = vsyncadd [#allocation3], 4294966784  ;;  %v23_v0 = vld [vmem:[#allocation2] sm:$0xff]  ;;  %v24_v1 = vld [vmem:[#allocation2 + $0x8] sm:$0xff]  ;;  %s130_s0 = smov [#allocation5]   ;;  %s63_s14 = sshll.u32 %s148_s1, 4  ;;  %s64_s14 = int_to_ptr.hbm [resolvable:$true] %s63_s14 }
   0x6   :  { %v25_v2 = vld [vmem:[#allocation2 + $0x10] sm:$0xff]  ;;  %v26_v3 = vld [vmem:[#allocation2 + $0x18] sm:$0xff]  ;;  %v33_v4 = vand.u32 2147483647, %v23_v0  ;;  %v34_v5 = vand.u32 2147483647, %v24_v1 }
   0x7   :  { %v35_v6 = vand.u32 2147483647, %v25_v2  ;;  %v36_v7 = vand.u32 2147483647, %v26_v3  ;;  %s61_s11 = sshll.u32 %s130_s0, 4  ;;  %vm54_vm0 = vcmask 0   ;;  %s62_s11 = int_to_ptr.vmem [resolvable:$true] %s61_s11 }
   0x8   :  { %v41_v8 = vmax.f32 %v33_v4, %v34_v5 }
   0x9   :  { %v42_v9 = vmax.f32 %v35_v6, %v36_v7 }
   0xb   :  { %v43_v10 = vmax.f32 %v41_v8, %v42_v9 }
   0xd   :  { %44 = vmax.xlane.f32.xlu0 %v43_v10 }
  0x80   :  { %v45_v11 = vpop.xlane.xlu0 %44 }
  0x81   :  { %v46_v12 = vrot.slane %v45_v11, 4 }
  0x83   :  { %v47_v13 = vmax.f32 %v45_v11, %v46_v12 }
  0x85   :  { %v48_v14 = vrot.slane %v47_v13, 2 }
  0x87   :  { %v49_v15 = vmax.f32 %v47_v13, %v48_v14 }
  0x89   :  { %v50_v16 = vrot.slane %v49_v15, 1 }
  0x8b   :  { %v51_v17 = vmax.f32 %v49_v15, %v50_v16 }
  0x8d   :  { %73 = vpush %v51_v17 }
  0xbe   :  { %s74_s15 = spop %73 }
  0xbf   :  { %v53_v18 = vstv %s74_s15 }
  0xc0   :  { %55 = vst.msk [vmem:[#allocation5] sm:$0x1] %vm54_vm0, %v53_v18 }
  0xc1   :  { %66 = dma.vmem_to_hbm [thread:$0]  %s62_s11, 16, %s64_s14, [#allocation4]  }
  0xc2   :  { %127 = dma.done.wait [#allocation4], 16  }
  0xc3   :  { %128 = vsyncadd [#allocation4], 4294967280 }
  0xc4   :  { %71 = vsyncpa [#allocation3], 1 }
  0xc5   :  { %72 = vsyncpa [#allocation4], 1 }

</bundles_post_ra>
